<compile_context>
chip_gen: v6e
topology: v6e:2x2x1
jax: 0.10.0
libtpu: 0.0.40
codegen_flags: <defaults>
</compile_context>

<pallas_src>
import functools

import jax
import jax.numpy as jnp
from jax.experimental import pallas as pl
from jax.experimental.pallas import tpu as pltpu


def _round_up(x, m):
    return (x + m - 1) // m * m


def _vmem_capacity_bytes():
    """Best-effort physical-VMEM query; conservative fallback (v7x per-TC)."""
    try:
        info = pltpu.get_tpu_info()
        for attr in ("vmem_capacity_bytes", "vmem_bytes", "vmem_size_bytes"):
            v = getattr(info, attr, None)
            if v:
                return int(v)
    except Exception:
        pass
    return 64 << 20


def _fc_matmul_kernel(x_ref, w_ref, b_ref, out_ref, acc_ref):
    """One (tm, tn) logits tile, K-tiled: out = x @ w + b.

    x_ref   : (tm, tk) bf16   gathered-embedding tile
    w_ref   : (tk, tn) bf16   fc weight tile, pre-transposed to (D, V) layout
    b_ref   : (1,  tn) f32    fc bias tile
    out_ref : (tm, tn)        logits tile (logits_dtype)
    acc_ref : (tm, tn) f32    VMEM accumulator, resident across the K axis
    """
    k = pl.program_id(2)

    @pl.when(k == 0)
    def _init():
        acc_ref[...] = jnp.zeros_like(acc_ref)

    # Canonical (M, K) x (K, N): straight MXU push path, no weight transpose.
    acc_ref[...] += jnp.dot(x_ref[...], w_ref[...],
                            preferred_element_type=jnp.float32)

    @pl.when(k == pl.num_programs(2) - 1)
    def _flush():
        out_ref[...] = (acc_ref[...] + b_ref[...]).astype(out_ref.dtype)


def _pick_tiles(M, Vp0, Dp0, out_bytes):
    """MXU-shaped tiles sized against this generation's VMEM."""
    tm = 256 if M >= 256 else max(16, _round_up(M, 16))  # bf16 packs (16,128)
    tn = min(512, Vp0)
    tk = min(2048, Dp0)

    def usage(tm_, tn_, tk_):
        x_b = 2 * tm_ * tk_ * 2          # bf16 activations, double-buffered
        w_b = 2 * tk_ * tn_ * 2          # bf16 weights,     double-buffered
        b_b = 2 * tn_ * 4
        o_b = 2 * tm_ * tn_ * out_bytes
        acc = tm_ * tn_ * 4
        return x_b + w_b + b_b + o_b + acc

    budget = max(16 << 20, min(_vmem_capacity_bytes() // 2, 96 << 20))
    while usage(tm, tn, tk) > budget:
        if tk > 512:
            tk = max(128, (tk // 2) // 128 * 128)
        elif tn > 512:
            tn = max(128, (tn // 2) // 128 * 128)
        elif tm >= 256:
            tm //= 2
        elif tk > 128:
            tk = max(128, (tk // 2) // 128 * 128)
        elif tn > 128:
            tn = max(128, (tn // 2) // 128 * 128)
        else:
            break

    # Keep both v7x TensorCores busy: if M gives only one tile, split vocab.
    if (_round_up(M, tm) // tm < 2 and _round_up(Vp0, tn) // tn < 2
            and Vp0 >= 256):
        tn = max(128, (Vp0 // 2) // 128 * 128)

    return tm, tn, tk


def base_model_forward(token_ids, emb_table, fc_weight, fc_bias, *,
                       pad_token_id=0,
                       compute_dtype=jnp.bfloat16,
                       logits_dtype=jnp.float32,
                       prefer_pallas=None):
    """token_ids (B, S) int32 -> logits (B, S, V).

    emb_table : (V, D) f32  (padding_idx row already zeroed, as nn.Embedding)
    fc_weight : (V, D) f32  PyTorch nn.Linear layout (out_features, in_features)
    fc_bias   : (V,)   f32
    """
    B, S = token_ids.shape
    V, D = emb_table.shape
    assert fc_weight.shape == (V, D), "fc must map embed_dim -> vocab_size"
    assert fc_bias.shape == (V,)
    M = B * S

    if prefer_pallas is None:
        # Tiny problems: padding to 128-lane tiles inflates MXU work ~V/Vp0 x
        # and pallas_call fixed overhead dominates; let XLA fuse gather+GEMM.
        prefer_pallas = (V >= 256) and (D >= 64) and (M >= 16)

    ids_flat = token_ids.reshape(M).astype(jnp.int32)

    if not prefer_pallas:
        x = jnp.take(emb_table.astype(compute_dtype), ids_flat, axis=0)
        logits = jnp.dot(x, fc_weight.astype(compute_dtype).T,
                         preferred_element_type=jnp.float32) + fc_bias
        return logits.astype(logits_dtype).reshape(B, S, V)

    Dp0 = _round_up(D, 128)
    Vp0 = _round_up(V, 128)
    out_bytes = jnp.dtype(logits_dtype).itemsize
    tm, tn, tk = _pick_tiles(M, Vp0, Dp0, out_bytes)

    Mp = _round_up(M, tm)
    Vp = _round_up(V, tn)
    Dp = _round_up(D, tk)

    # --- glue (plain JAX, fuses under jit) ----------------------------------
    # Gather in compute dtype; pad the cheap id vector, never the (M, D)
    # activation matrix -> a single half-width HBM pass for x.
    ids_p = jnp.pad(ids_flat, (0, Mp - M), constant_values=pad_token_id)
    emb_c = jnp.pad(emb_table.astype(compute_dtype), ((0, 0), (0, Dp - D)))
    x = jnp.take(emb_c, ids_p, axis=0)                           # (Mp, Dp)

    # One-time static transform: weight pre-transposed so the kernel sees the
    # canonical (K, N) RHS; padded cols/rows are zero so padded logits = bias.
    w_p = jnp.pad(fc_weight.T.astype(compute_dtype), ((0, Dp - D), (0, Vp - V)))
    b_p = jnp.pad(fc_bias, (0, Vp - V)).reshape(1, Vp).astype(jnp.float32)

    # --- tiled, double-buffered GEMM + bias on the MXU ----------------------
    grid = (Mp // tm, Vp // tn, Dp // tk)
    vmem_limit = int(min(_vmem_capacity_bytes() * 3 // 4, 100 << 20))

    logits_p = pl.pallas_call(
        _fc_matmul_kernel,
        out_shape=jax.ShapeDtypeStruct((Mp, Vp), logits_dtype),
        grid_spec=pltpu.PrefetchScalarGridSpec(
            num_scalar_prefetch=0,
            grid=grid,
            in_specs=[
                pl.BlockSpec((tm, tk), lambda i, j, k: (i, k)),   # activations
                pl.BlockSpec((tk, tn), lambda i, j, k: (k, j)),   # W^T (K, N)
                pl.BlockSpec((1, tn), lambda i, j, k: (0, j)),    # bias
            ],
            out_specs=pl.BlockSpec((tm, tn), lambda i, j, k: (i, j)),
            scratch_shapes=[pltpu.VMEM((tm, tn), jnp.float32)],
        ),
        compiler_params=pltpu.CompilerParams(
            dimension_semantics=("parallel", "parallel", "arbitrary"),
            vmem_limit_bytes=vmem_limit),
    )(x, w_p, b_p)

    return logits_p[:M, :V].reshape(B, S, V)


if __name__ == "__main__":
    # Small but kernel-meaningful shapes consistent with the module
    # (embedding V x D, fc: embed_dim -> vocab_size).
    vocab_size, embed_dim, pad_token_id = 512, 128, 0
    batch, seq = 2, 64

    key = jax.random.PRNGKey(0)
    k_emb, k_w, k_b, k_ids = jax.random.split(key, 4)

    # nn.Embedding default init: N(0, 1); padding_idx row zeroed.
    emb_table = jax.random.normal(k_emb, (vocab_size, embed_dim), jnp.float32)
    emb_table = emb_table.at[pad_token_id].set(0.0)

    # nn.Linear default init: U(-1/sqrt(in), 1/sqrt(in)).
    bound = 1.0 / (embed_dim ** 0.5)
    fc_weight = jax.random.uniform(k_w, (vocab_size, embed_dim),
                                   jnp.float32, -bound, bound)
    fc_bias = jax.random.uniform(k_b, (vocab_size,), jnp.float32, -bound, bound)

    token_ids = jax.random.randint(k_ids, (batch, seq), 0, vocab_size,
                                   dtype=jnp.int32)

    fwd = jax.jit(functools.partial(base_model_forward,
                                    pad_token_id=pad_token_id))
    logits = jax.block_until_ready(fwd(token_ids, emb_table, fc_weight, fc_bias))

    # Reference mirroring kernel numerics (bf16 MXU inputs, f32 accumulate).
    x_ref = emb_table[token_ids].astype(jnp.bfloat16).astype(jnp.float32)
    w_ref = fc_weight.astype(jnp.bfloat16).astype(jnp.float32)
    ref = x_ref @ w_ref.T + fc_bias

    assert logits.shape == (batch, seq, vocab_size)
    err = float(jnp.max(jnp.abs(logits - ref)))
    assert jnp.allclose(logits, ref, atol=5e-3, rtol=5e-3), err

    # Tiny-shape path: below the size threshold we dispatch to fused XLA.
    tiny_logits = base_model_forward(token_ids[:, :8] % 32, emb_table[:32, :16],
                                     fc_weight[:32, :16], fc_bias[:32],
                                     pad_token_id=pad_token_id)
    tiny_logits = jax.block_until_ready(tiny_logits)
    assert tiny_logits.shape == (batch, 8, 32)

    # TODO(synk): predict_next_token / generate are abstract sampling loops
    # (tokenizer + autoregressive decode) and are not kernel work.
    print("KERNEL_OK")
</pallas_src>

<mosaic_0001>
module attributes {stable_mosaic.version = 11 : i64} {
  func.func @_fc_matmul_kernel(%arg0: i32, %arg1: i32, %arg2: i32, %arg3: memref<128x128xbf16, #tpu.memory_space<vmem>>, %arg4: memref<128x256xbf16, #tpu.memory_space<vmem>>, %arg5: memref<1x256xf32, #tpu.memory_space<vmem>>, %arg6: memref<128x256xf32, #tpu.memory_space<vmem>>, %arg7: memref<128x256xf32, #tpu.memory_space<vmem>>) attributes {dimension_semantics = [#tpu.dimension_semantics<parallel>, #tpu.dimension_semantics<parallel>, #tpu.dimension_semantics<arbitrary>], iteration_bounds = array<i64: 1, 2, 1>, scalar_prefetch = 0 : i64, scratch_operands = 1 : i64, tpu.core_type = #tpu.core_type<tc>, window_params = [{transform_indices = @transform_0, window_bounds = array<i64: 128, 128>}, {transform_indices = @transform_1, window_bounds = array<i64: 128, 256>}, {transform_indices = @transform_2, window_bounds = array<i64: 1, 256>}, {transform_indices = @transform_3, window_bounds = array<i64: 128, 256>}]} {
    %c0_i32 = arith.constant 0 : i32
    %0 = arith.cmpi eq, %arg2, %c0_i32 : i32
    %1 = arith.extui %0 : i1 to i32
    %c0_i32_0 = arith.constant 0 : i32
    %2 = arith.cmpi ne, %1, %c0_i32_0 : i32
    scf.if %2 {
      %cst_10 = arith.constant 0.000000e+00 : f32
      %12 = vector.broadcast %cst_10 : f32 to vector<128x256xf32>
      %c0_11 = arith.constant 0 : index
      %c0_12 = arith.constant 0 : index
      %13 = vector.load %arg7[%c0_11, %c0_12] : memref<128x256xf32, #tpu.memory_space<vmem>>, vector<128x256xf32>
      tpu.vector_store %arg7[%c0_11, %c0_12], %12 {strides = array<i32>} : memref<128x256xf32, #tpu.memory_space<vmem>>, vector<128x256xf32>,
    } else {
    }
    %c0 = arith.constant 0 : index
    %c0_1 = arith.constant 0 : index
    %3 = vector.load %arg7[%c0, %c0_1] : memref<128x256xf32, #tpu.memory_space<vmem>>, vector<128x256xf32>
    %c0_2 = arith.constant 0 : index
    %c0_3 = arith.constant 0 : index
    %4 = vector.load %arg3[%c0_2, %c0_3] : memref<128x128xbf16, #tpu.memory_space<vmem>>, vector<128x128xbf16>
    %c0_4 = arith.constant 0 : index
    %c0_5 = arith.constant 0 : index
    %5 = vector.load %arg4[%c0_4, %c0_5] : memref<128x256xbf16, #tpu.memory_space<vmem>>, vector<128x256xbf16>
    %cst = arith.constant dense<0.000000e+00> : vector<128x256xf32>
    %6 = tpu.matmul %4, %5, %cst {dimension_numbers = #tpu.dot_dimension_numbers<[1], [0], [0], [1], [0, 0, 1, 1], [], []>} : vector<128x128xbf16>, vector<128x256xbf16>, vector<128x256xf32> -> vector<128x256xf32>
    %7 = arith.addf %3, %6 : vector<128x256xf32>
    %c0_6 = arith.constant 0 : index
    %c0_7 = arith.constant 0 : index
    %8 = vector.load %arg7[%c0_6, %c0_7] : memref<128x256xf32, #tpu.memory_space<vmem>>, vector<128x256xf32>
    tpu.vector_store %arg7[%c0_6, %c0_7], %7 {strides = array<i32>} : memref<128x256xf32, #tpu.memory_space<vmem>>, vector<128x256xf32>,
    %c0_i32_8 = arith.constant 0 : i32
    %9 = arith.cmpi eq, %arg2, %c0_i32_8 : i32
    %10 = arith.extui %9 : i1 to i32
    %c0_i32_9 = arith.constant 0 : i32
    %11 = arith.cmpi ne, %10, %c0_i32_9 : i32
    scf.if %11 {
      %c0_10 = arith.constant 0 : index
      %c0_11 = arith.constant 0 : index
      %12 = vector.load %arg7[%c0_10, %c0_11] : memref<128x256xf32, #tpu.memory_space<vmem>>, vector<128x256xf32>
      %c0_12 = arith.constant 0 : index
      %c0_13 = arith.constant 0 : index
      %13 = vector.load %arg5[%c0_12, %c0_13] : memref<1x256xf32, #tpu.memory_space<vmem>>, vector<1x256xf32>
      %14 = vector.broadcast %13 : vector<1x256xf32> to vector<128x256xf32>
      %15 = arith.addf %12, %14 : vector<128x256xf32>
      %c0_14 = arith.constant 0 : index
      %c0_15 = arith.constant 0 : index
      %16 = vector.load %arg6[%c0_14, %c0_15] : memref<128x256xf32, #tpu.memory_space<vmem>>, vector<128x256xf32>
      tpu.vector_store %arg6[%c0_14, %c0_15], %15 {strides = array<i32>} : memref<128x256xf32, #tpu.memory_space<vmem>>, vector<128x256xf32>,
    } else {
    }
    return
  }
  func.func @transform_0(%arg0: i32, %arg1: i32, %arg2: i32) -> (i32, i32) {
    %c0_i32 = arith.constant 0 : i32
    return %arg0, %arg2 : i32, i32
  }
  func.func @transform_1(%arg0: i32, %arg1: i32, %arg2: i32) -> (i32, i32) {
    %c0_i32 = arith.constant 0 : i32
    return %arg2, %arg1 : i32, i32
  }
  func.func @transform_2(%arg0: i32, %arg1: i32, %arg2: i32) -> (i32, i32) {
    %c0_i32 = arith.constant 0 : i32
    %c0_i32_0 = arith.constant 0 : i32
    return %c0_i32, %arg1 : i32, i32
  }
  func.func @transform_3(%arg0: i32, %arg1: i32, %arg2: i32) -> (i32, i32) {
    %c0_i32 = arith.constant 0 : i32
    return %arg0, %arg1 : i32, i32
  }
}

</mosaic_0001>

<bundles_post_ra>
// kernel: base_model_forward.1
= control target key start
LH: loop header
LB: loop body
LE: loop exit
PB: predicated region body
PF: predicated region fallthrough
CT: control target
= control target key end

     0   :  { %8 = vsyncpa [#allocation5], 0  ;;  %s1512_s0 = inlined_call_operand.vmem [shape: bf16[128,128], index: 0, kind: input, shape index: {}]   ;;  %s1513_s1 = inlined_call_operand.vmem [shape: bf16[128,512], index: 1, kind: input, shape index: {}]   ;;  %s1514_s2 = inlined_call_operand.vmem [shape: f32[1,512], index: 2, kind: input, shape index: {}]   ;;  %s1515_s3 = inlined_call_operand.hbm [shape: f32[128,512], index: 3, kind: output, shape index: {}]  }
   0x1   :  { %10 = vsyncpa [#allocation5 + $0x1], 0  ;;  %s1246_s12 = smov 0   ;;  %s1248_s13 = smov 0  }
   0x2   :  { %s1250_s14 = smov 0   ;;  %s1252_s15 = smov 0  }
   0x3   :  { %s1254_s16 = smov 0   ;;  %s1256_s17 = smov 0  }
   0x4 LB: > { %s993_s18 = sadd.s32 4294967295, %s1219_s17   ;;  %s994_s19 = sadd.s32 4294967294, %s1219_s17   ;;  %s1219_s17 = sphi %s1256_s17, %s16_s17   ;;  %s1215_s16 = sphi %s1254_s16, %s1522_s16   ;;  %s1211_s15 = sphi %s1252_s15, %s1521_s15   ;;  %s1207_s14 = sphi %s1250_s14, %s1520_s14   ;;  %s1203_s13 = sphi %s1248_s13, %s1519_s13   ;;  %s1199_s12 = sphi %s1246_s12, %s1518_s12  }
   0x5   : > { %s31_s20 = sadd.s32 1, %s1215_s16  ;;  %s72_s21 = sadd.s32 1, %s1207_s14 }
   0x6   : > { %p33_p0 = scmp.ge.s32.totalorder %s31_s20, 2  ;;  %p79_p1 = scmp.ne.s32.totalorder %s1207_s14, %s1203_s13 }
   0x7   : > { %p80_p2 = scmp.eq.s32.totalorder %s1219_s17, 0  ;;  %p137_p3 = scmp.eq.s32.totalorder %s993_s18, 1 }
   0x8   : > { %s1524_s20 = smov (%p33_p0, %s31_s20), 0  ;;  %p142_p6 = scmp.ne.s32.totalorder %s1203_s13, %s1199_s12 }
   0x9   : > { %p81_p4 = por %p80_p2, %p79_p1  ;;  %p1285_p5 = por %p137_p3, %p79_p1 }
   0xa   : > { %s68_s23 = ssub.s32 %s1215_s16, %s1524_s20  ;;  %p143_p8 = scmp.eq.s32.totalorder %s994_s19, 1 }
   0xb   : > { %p70_p7 = scmp.eq.s32.totalorder %s68_s23, 0  ;;  %p997_p10 = scmp.ge.s32.totalorder %s1219_s17, 2 }
   0xc   : > { %p1296_p9 = por %p143_p8, %p142_p6 }
   0xd   : > { %s1294_s24 = scalar_select %p70_p7, %s1207_s14, %s72_s21  }
   0xe   : > { %171 = sbr.rel (%p997_p10) target bundleno = 31 (0x1f), region = 20 }
  0x13   : > { %174 = sbr.rel (!%p81_p4) target bundleno = 31 (0x1f), region = 24  ;;  %s176_s26 = sand.u32 (%p81_p4), 1, %s1207_s14  }
  0x14   : > { %s1034_s27 = sshll.u32 (%p81_p4), %s1215_s16, 3  ;;  %s998_s28 = sshll.u32 (%p81_p4), %s176_s26, 7 }
  0x15   : > { %s1308_s4 = scalar_lea.vmem (%p81_p4), %s1513_s1, %s1034_s27  ;;  %s178_s5 = scalar_lea.vmem (%p81_p4), [#allocation3], %s998_s28 }
  0x16   : > { %v243_v0 = vld [vmem:[%s1308_s4] sm:$0xff] (%p81_p4)  ;;  %v245_v1 = vld [vmem:[%s1308_s4 + $0x10] sm:$0xff] (%p81_p4) }
  0x17   : > { %v247_v2 = vld [vmem:[%s1308_s4 + $0x20] sm:$0xff] (%p81_p4)  ;;  %244 = vst [vmem:[%s178_s5] sm:$0xff] (%p81_p4), %v243_v0  ;;  %246 = vst [vmem:[%s178_s5 + $0x8] sm:$0xff] (%p81_p4), %v245_v1  ;;  %v249_v3 = vld [vmem:[%s1308_s4 + $0x30] sm:$0xff] (%p81_p4) }
  0x18   : > { %248 = vst [vmem:[%s178_s5 + $0x10] sm:$0xff] %v247_v2  ;;  %v251_v4 = vld [vmem:[%s1308_s4 + $0x40] sm:$0xff]  ;;  %v253_v5 = vld [vmem:[%s1308_s4 + $0x50] sm:$0xff]  ;;  %250 = vst [vmem:[%s178_s5 + $0x18] sm:$0xff] %v249_v3 }
  0x19   : > { %252 = vst [vmem:[%s178_s5 + $0x20] sm:$0xff] %v251_v4  ;;  %254 = vst [vmem:[%s178_s5 + $0x28] sm:$0xff] %v253_v5  ;;  %v255_v6 = vld [vmem:[%s1308_s4 + $0x60] sm:$0xff]  ;;  %v257_v7 = vld [vmem:[%s1308_s4 + $0x70] sm:$0xff] }
  0x1a   : > { %v259_v8 = vld [vmem:[%s1308_s4 + $0x80] sm:$0xff]  ;;  %256 = vst [vmem:[%s178_s5 + $0x30] sm:$0xff] %v255_v6  ;;  %258 = vst [vmem:[%s178_s5 + $0x38] sm:$0xff] %v257_v7  ;;  %v261_v9 = vld [vmem:[%s1308_s4 + $0x90] sm:$0xff] }
  0x1b   : > { %260 = vst [vmem:[%s178_s5 + $0x40] sm:$0xff] %v259_v8  ;;  %v263_v10 = vld [vmem:[%s1308_s4 + $0xa0] sm:$0xff]  ;;  %v265_v11 = vld [vmem:[%s1308_s4 + $0xb0] sm:$0xff]  ;;  %262 = vst [vmem:[%s178_s5 + $0x48] sm:$0xff] %v261_v9 }
  0x1c   : > { %264 = vst [vmem:[%s178_s5 + $0x50] sm:$0xff] %v263_v10  ;;  %266 = vst [vmem:[%s178_s5 + $0x58] sm:$0xff] %v265_v11  ;;  %v267_v12 = vld [vmem:[%s1308_s4 + $0xc0] sm:$0xff]  ;;  %v269_v13 = vld [vmem:[%s1308_s4 + $0xd0] sm:$0xff] }
  0x1d   : > { %v271_v14 = vld [vmem:[%s1308_s4 + $0xe0] sm:$0xff]  ;;  %268 = vst [vmem:[%s178_s5 + $0x60] sm:$0xff] %v267_v12  ;;  %270 = vst [vmem:[%s178_s5 + $0x68] sm:$0xff] %v269_v13  ;;  %v273_v15 = vld [vmem:[%s1308_s4 + $0xf0] sm:$0xff] }
  0x1e   : > { %272 = vst [vmem:[%s178_s5 + $0x70] sm:$0xff] %v271_v14  ;;  %274 = vst [vmem:[%s178_s5 + $0x78] sm:$0xff] %v273_v15 }
  0x1f PF: > { %p1001_p11 = scmp.ge.s32.totalorder %s1219_s17, 1  ;;  %p287_p12 = scmp.lt.s32.totalorder %s1219_s17, 3 }
  0x21   : > { %p288_p13 = pnand %p1001_p11, %p287_p12 }
  0x22   : > { %s1329_s6 = sand.u32 (!%p288_p13), 1, %s1203_s13   ;;  %s1004_s9 = sshll.u32 (!%p288_p13), %s1211_s15, 1 }
  0x23   : > { %291 = sbr.rel (%p288_p13) target bundleno = 314 (0x13a), region = 66  ;;  %s1002_s7 = sshll.u32 (!%p288_p13), %s1329_s6, 7 }
  0x24   : > { %s1334_s8 = scalar_lea.vmem (!%p288_p13), [#allocation3], %s1002_s7  ;;  %p341_p0 = scmp.lt.s32.totalorder (!%p288_p13), %s1004_s9, 3 }
  0x25   : > { %s1003_s19 = sshll.u32 (!%p288_p13), %s1329_s6, 8  ;;  %s1035_s23 = sshll.u32 (!%p288_p13), %s1211_s15, 8 }
  0x26   : > { %s1393_s21 = scalar_lea.vmem (!%p288_p13), [#allocation4], %s1003_s19  ;;  %s1456_s28 = scalar_lea.hbm (!%p288_p13), %s1515_s3, %s1035_s23 }
  0x27   : > { %s881_s26 = sshll.u32 (!%p288_p13), %s1393_s21, 4  ;;  %s865_s29 = scalar_lea.sflag (!%p288_p13), [#allocation5], %s1329_s6  ;;  %s1458_s26 = int_to_ptr.vmem [resolvable:$true] %s881_s26 }
  0x28   : > { %v1221_v16 = vmov 0   ;;  %v1111_v17 = vld [vmem:[%s1334_s8 + $0x74] ss:$8 sps:$4 sm:$0xff]   ;;  %v1113_v18 = vld [vmem:[%s1334_s8 + $0x70] ss:$8 sps:$4 sm:$0xff]   ;;  %v1135_v33 = vld [vmem:[%s1512_s0] sm:$0xff]   ;;  %v790_v41 = vlaneseq }
  0x29   : > { %608 = vmatprep.mubr.bf16.mxu0 %v1221_v16  ;;  %648 = vmatprep.mubr.bf16.mxu1 %v1221_v16  ;;  %v1114_v19 = vld [vmem:[%s1334_s8 + $0x64] ss:$8 sps:$4 sm:$0xff]   ;;  %v1116_v20 = vld [vmem:[%s1334_s8 + $0x60] ss:$8 sps:$4 sm:$0xff]   ;;  %v1117_v21 = vld [vmem:[%s1334_s8 + $0x54] ss:$8 sps:$4 sm:$0xff]  }
  0x2a   : > { %576 = vmatprep.subr.bf16.mxu0 %v1111_v17  ;;  %1036 = vmatprep.subr.bf16.mxu1 %v1111_v17  ;;  %v1119_v22 = vld [vmem:[%s1334_s8 + $0x50] ss:$8 sps:$4 sm:$0xff]   ;;  %v1120_v23 = vld [vmem:[%s1334_s8 + $0x44] ss:$8 sps:$4 sm:$0xff]   ;;  %v1122_v24 = vld [vmem:[%s1334_s8 + $0x40] ss:$8 sps:$4 sm:$0xff]  }
  0x2b   : > { %577 = vmatpush1.bf16.msra.mxu0 %v1113_v18  ;;  %1044 = vmatpush1.bf16.msra.mxu1 %v1113_v18  ;;  %v1123_v25 = vld [vmem:[%s1334_s8 + $0x34] ss:$8 sps:$4 sm:$0xff]   ;;  %v1125_v26 = vld [vmem:[%s1334_s8 + $0x30] ss:$8 sps:$4 sm:$0xff]   ;;  %v1126_v27 = vld [vmem:[%s1334_s8 + $0x24] ss:$8 sps:$4 sm:$0xff]  }
  0x2c   : > { %578 = vmatprep.subr.bf16.mxu0 %v1114_v19  ;;  %1037 = vmatprep.subr.bf16.mxu1 %v1114_v19  ;;  %v1128_v28 = vld [vmem:[%s1334_s8 + $0x20] ss:$8 sps:$4 sm:$0xff]   ;;  %v1129_v29 = vld [vmem:[%s1334_s8 + $0x14] ss:$8 sps:$4 sm:$0xff]   ;;  %v1131_v30 = vld [vmem:[%s1334_s8 + $0x10] ss:$8 sps:$4 sm:$0xff]  }
  0x2d   : > { %v1132_v31 = vld [vmem:[%s1334_s8 + $0x4] ss:$8 sps:$4 sm:$0xff]   ;;  %v1134_v32 = vld [vmem:[%s1334_s8] ss:$8 sps:$4 sm:$0xff]   ;;  %v1139_v37 = vld [vmem:[%s1512_s0 + $0x10] sm:$0xff]   ;;  %s1526_s9 = smov (!%p341_p0, %s1004_s9), 3 }
  0x2e   : > { %v1136_v34 = vld [vmem:[%s1512_s0 + $0x20] sm:$0xff]   ;;  %v1137_v35 = vld [vmem:[%s1512_s0 + $0x8] sm:$0xff]   ;;  %v1140_v38 = vld [vmem:[%s1512_s0 + $0x30] sm:$0xff]   ;;  %v791_v42 = vshrl.u32 %v790_v41, 7  ;;  %s343_s18 = scalar_lea.vmem %s1514_s2, %s1526_s9  ;;  %s1143_s30 = scalar_lea.vmem %s1458_s26, 4096 }
  0x2f   : > { %579 = vmatpush1.bf16.msra.mxu0 %v1116_v20  ;;  %1045 = vmatpush1.bf16.msra.mxu1 %v1116_v20  ;;  %v1138_v36 = vld [vmem:[%s1512_s0 + $0x28] sm:$0xff]   ;;  %v1141_v39 = vld [vmem:[%s1512_s0 + $0x18] sm:$0xff]   ;;  %v788_v44 = vld [vmem:[%s343_s18] sm:$0x3]  ;;  %p1144_p1 = scmp.ne.s32.totalorder %s1458_s26, %s1143_s30  ;;  %s1222_s4 = smov [#allocation4]  }
  0x30   : > { %580 = vmatprep.subr.bf16.mxu0 %v1117_v21  ;;  %1038 = vmatprep.subr.bf16.mxu1 %v1117_v21  ;;  %v1142_v40 = vld [vmem:[%s1512_s0 + $0x38] sm:$0xff]   ;;  %v792_v43 = vsub.s32 0, %v791_v42  ;;  %v796_v45 = vsub.s32 1, %v791_v42  ;;  %s1147_s5 = sshll.u32 %s1222_s4, 4  ;;  %s1148_s5 = int_to_ptr.vmem [resolvable:$false] %s1147_s5 }
  0x31   : > { %p1145_p2 = pnand %p1144_p1, %p1285_p5  ;;  %s1149_s7 = scalar_lea.vmem %s1148_s5, 8192 }
  0x32   : > { %v1387_v46 = vrot.slane %v788_v44, %v792_v43  ;;  %v1389_v47 = vrot.slane %v788_v44, %v796_v45  ;;  %p1150_p4 = scmp.lt.s32.totalorder %s1458_s26, %s1148_s5  ;;  %p1151_p6 = scmp.lt.s32.totalorder %s1149_s7, %s1143_s30 }
  0x33   : > { %581 = vmatpush1.bf16.msra.mxu0 %v1119_v22  ;;  %1046 = vmatpush1.bf16.msra.mxu1 %v1119_v22  ;;  %p1146_p3 = pneg %p1145_p2 }
  0x34   : > { %582 = vmatprep.subr.bf16.mxu0 %v1120_v23  ;;  %1039 = vmatprep.subr.bf16.mxu1 %v1120_v23  ;;  %p1152_p7 = por %p1151_p6, %p1150_p4 }
  0x36   : > { %p1153_p8 = pnand %p1152_p7, %p1146_p3 }
  0x37   : > { %583 = vmatpush1.bf16.msra.mxu0 %v1122_v24  ;;  %1047 = vmatpush1.bf16.msra.mxu1 %v1122_v24 }
  0x38   : > { %584 = vmatprep.subr.bf16.mxu0 %v1123_v25  ;;  %1040 = vmatprep.subr.bf16.mxu1 %v1123_v25 }
  0x3b   : > { %585 = vmatpush1.bf16.msra.mxu0 %v1125_v26  ;;  %1048 = vmatpush1.bf16.msra.mxu1 %v1125_v26 }
  0x3c   : > { %586 = vmatprep.subr.bf16.mxu0 %v1126_v27  ;;  %1041 = vmatprep.subr.bf16.mxu1 %v1126_v27 }
  0x3f   : > { %587 = vmatpush1.bf16.msra.mxu0 %v1128_v28  ;;  %1049 = vmatpush1.bf16.msra.mxu1 %v1128_v28 }
  0x40   : > { %588 = vmatprep.subr.bf16.mxu0 %v1129_v29  ;;  %1042 = vmatprep.subr.bf16.mxu1 %v1129_v29 }
  0x43   : > { %589 = vmatpush1.bf16.msra.mxu0 %v1131_v30  ;;  %1050 = vmatpush1.bf16.msra.mxu1 %v1131_v30 }
  0x44   : > { %590 = vmatprep.subr.bf16.mxu0 %v1132_v31  ;;  %1043 = vmatprep.subr.bf16.mxu1 %v1132_v31 }
  0x47   : > { %591 = vmatpush1.bf16.msra.mxu0 %v1134_v32  ;;  %1051 = vmatpush1.bf16.msra.mxu1 %v1134_v32 }
  0x4a   : > { %609 = vmatmul.mubr.bf16.vlgmr.msra.gmra.mxu0 %v1135_v33  ;;  %649 = vmatmul.mubr.bf16.vlgmr.msra.gmra.mxu1 %v1136_v34 }
  0x4b   : > { %618 = vmatprep.mubr.bf16.mxu0 %v1221_v16  ;;  %658 = vmatprep.mubr.bf16.mxu1 %v1221_v16 }
  0x52   : > { %619 = vmatmul.mubr.bf16.gmra.mxu0 %v1137_v35  ;;  %659 = vmatmul.mubr.bf16.gmra.mxu1 %v1138_v36 }
  0x53   : > { %628 = vmatprep.mubr.bf16.mxu0 %v1221_v16  ;;  %668 = vmatprep.mubr.bf16.mxu1 %v1221_v16 }
  0x5a   : > { %629 = vmatmul.mubr.bf16.gmra.mxu0 %v1139_v37  ;;  %669 = vmatmul.mubr.bf16.gmra.mxu1 %v1140_v38 }
  0x5b   : > { %638 = vmatprep.mubr.bf16.mxu0 %v1221_v16  ;;  %678 = vmatprep.mubr.bf16.mxu1 %v1221_v16 }
  0x62   : > { %639 = vmatmul.mubr.bf16.gmra.mxu0 %v1141_v39  ;;  %679 = vmatmul.mubr.bf16.gmra.mxu1 %v1142_v40 }
 0x10a   : > { %v610_v48 = vpop.f32.mrf.mxu0  ;;  %v650_v49 = vpop.f32.mrf.mxu1 }
 0x10b   : > { %v800_v50 = vadd.f32 %v1387_v46, %v610_v48  ;;  %v816_v51 = vadd.f32 %v1387_v46, %v650_v49 }
 0x10c   : > { %v612_v52 = vpop.f32.mrf.mxu0  ;;  %v652_v53 = vpop.f32.mrf.mxu1 }
 0x10d   : > { %832 = vst [vmem:[%s1393_s21] sm:$0xff] %v800_v50  ;;  %848 = vst [vmem:[%s1393_s21 + $0x80] sm:$0xff] %v816_v51  ;;  %v801_v54 = vadd.f32 %v1389_v47, %v612_v52  ;;  %v817_v55 = vadd.f32 %v1389_v47, %v652_v53 }
 0x10e   : > { %v614_v56 = vpop.f32.mrf.mxu0  ;;  %v654_v57 = vpop.f32.mrf.mxu1 }
 0x10f   : > { %833 = vst [vmem:[%s1393_s21 + $0x8] sm:$0xff] %v801_v54  ;;  %849 = vst [vmem:[%s1393_s21 + $0x88] sm:$0xff] %v817_v55  ;;  %v802_v58 = vadd.f32 %v1387_v46, %v614_v56  ;;  %v818_v59 = vadd.f32 %v1387_v46, %v654_v57 }
 0x110   : > { %v616_v60 = vpop.f32.mrf.mxu0  ;;  %v656_v61 = vpop.f32.mrf.mxu1 }
 0x111   : > { %834 = vst [vmem:[%s1393_s21 + $0x10] sm:$0xff] %v802_v58  ;;  %850 = vst [vmem:[%s1393_s21 + $0x90] sm:$0xff] %v818_v59  ;;  %v803_v62 = vadd.f32 %v1389_v47, %v616_v60  ;;  %v819_v63 = vadd.f32 %v1389_v47, %v656_v61 }
 0x112   : > { %v620_v0 = vpop.f32.mrf.mxu0  ;;  %v660_v1 = vpop.f32.mrf.mxu1 }
 0x113   : > { %835 = vst [vmem:[%s1393_s21 + $0x18] sm:$0xff] %v803_v62  ;;  %851 = vst [vmem:[%s1393_s21 + $0x98] sm:$0xff] %v819_v63  ;;  %v804_v2 = vadd.f32 %v1387_v46, %v620_v0  ;;  %v820_v3 = vadd.f32 %v1387_v46, %v660_v1 }
 0x114   : > { %v622_v4 = vpop.f32.mrf.mxu0  ;;  %v662_v5 = vpop.f32.mrf.mxu1 }
 0x115   : > { %836 = vst [vmem:[%s1393_s21 + $0x20] sm:$0xff] %v804_v2  ;;  %852 = vst [vmem:[%s1393_s21 + $0xa0] sm:$0xff] %v820_v3  ;;  %v805_v6 = vadd.f32 %v1389_v47, %v622_v4  ;;  %v821_v7 = vadd.f32 %v1389_v47, %v662_v5 }
 0x116   : > { %v624_v8 = vpop.f32.mrf.mxu0  ;;  %v664_v9 = vpop.f32.mrf.mxu1 }
 0x117   : > { %837 = vst [vmem:[%s1393_s21 + $0x28] sm:$0xff] %v805_v6  ;;  %853 = vst [vmem:[%s1393_s21 + $0xa8] sm:$0xff] %v821_v7  ;;  %v806_v10 = vadd.f32 %v1387_v46, %v624_v8  ;;  %v822_v11 = vadd.f32 %v1387_v46, %v664_v9 }
 0x118   : > { %v626_v12 = vpop.f32.mrf.mxu0  ;;  %v666_v13 = vpop.f32.mrf.mxu1 }
 0x119   : > { %838 = vst [vmem:[%s1393_s21 + $0x30] sm:$0xff] %v806_v10  ;;  %854 = vst [vmem:[%s1393_s21 + $0xb0] sm:$0xff] %v822_v11  ;;  %v807_v14 = vadd.f32 %v1389_v47, %v626_v12  ;;  %v823_v15 = vadd.f32 %v1389_v47, %v666_v13 }
 0x11a   : > { %v630_v16 = vpop.f32.mrf.mxu0  ;;  %v670_v17 = vpop.f32.mrf.mxu1 }
 0x11b   : > { %839 = vst [vmem:[%s1393_s21 + $0x38] sm:$0xff] %v807_v14  ;;  %855 = vst [vmem:[%s1393_s21 + $0xb8] sm:$0xff] %v823_v15  ;;  %v808_v18 = vadd.f32 %v1387_v46, %v630_v16  ;;  %v824_v19 = vadd.f32 %v1387_v46, %v670_v17 }
 0x11c   : > { %v632_v20 = vpop.f32.mrf.mxu0  ;;  %v672_v21 = vpop.f32.mrf.mxu1 }
 0x11d   : > { %840 = vst [vmem:[%s1393_s21 + $0x40] sm:$0xff] %v808_v18  ;;  %856 = vst [vmem:[%s1393_s21 + $0xc0] sm:$0xff] %v824_v19  ;;  %v809_v22 = vadd.f32 %v1389_v47, %v632_v20  ;;  %v825_v23 = vadd.f32 %v1389_v47, %v672_v21 }
 0x11e   : > { %v634_v24 = vpop.f32.mrf.mxu0  ;;  %v674_v25 = vpop.f32.mrf.mxu1 }
 0x11f   : > { %841 = vst [vmem:[%s1393_s21 + $0x48] sm:$0xff] %v809_v22  ;;  %857 = vst [vmem:[%s1393_s21 + $0xc8] sm:$0xff] %v825_v23  ;;  %v810_v26 = vadd.f32 %v1387_v46, %v634_v24  ;;  %v826_v27 = vadd.f32 %v1387_v46, %v674_v25 }
 0x120   : > { %v636_v28 = vpop.f32.mrf.mxu0  ;;  %v676_v29 = vpop.f32.mrf.mxu1 }
 0x121   : > { %842 = vst [vmem:[%s1393_s21 + $0x50] sm:$0xff] %v810_v26  ;;  %858 = vst [vmem:[%s1393_s21 + $0xd0] sm:$0xff] %v826_v27  ;;  %v811_v30 = vadd.f32 %v1389_v47, %v636_v28  ;;  %v827_v31 = vadd.f32 %v1389_v47, %v676_v29 }
 0x122   : > { %v640_v32 = vpop.f32.mrf.mxu0  ;;  %v680_v33 = vpop.f32.mrf.mxu1 }
 0x123   : > { %843 = vst [vmem:[%s1393_s21 + $0x58] sm:$0xff] %v811_v30  ;;  %859 = vst [vmem:[%s1393_s21 + $0xd8] sm:$0xff] %v827_v31  ;;  %v812_v34 = vadd.f32 %v1387_v46, %v640_v32  ;;  %v828_v35 = vadd.f32 %v1387_v46, %v680_v33 }
 0x124   : > { %v642_v36 = vpop.f32.mrf.mxu0  ;;  %v682_v37 = vpop.f32.mrf.mxu1 }
 0x125   : > { %844 = vst [vmem:[%s1393_s21 + $0x60] sm:$0xff] %v812_v34  ;;  %860 = vst [vmem:[%s1393_s21 + $0xe0] sm:$0xff] %v828_v35  ;;  %v813_v38 = vadd.f32 %v1389_v47, %v642_v36  ;;  %v829_v39 = vadd.f32 %v1389_v47, %v682_v37 }
 0x126   : > { %v644_v40 = vpop.f32.mrf.mxu0  ;;  %v684_v41 = vpop.f32.mrf.mxu1 }
 0x127   : > { %845 = vst [vmem:[%s1393_s21 + $0x68] sm:$0xff] %v813_v38  ;;  %861 = vst [vmem:[%s1393_s21 + $0xe8] sm:$0xff] %v829_v39  ;;  %v814_v42 = vadd.f32 %v1387_v46, %v644_v40  ;;  %v830_v43 = vadd.f32 %v1387_v46, %v684_v41 }
 0x128   : > { %v646_v44 = vpop.f32.mrf.mxu0  ;;  %v686_v45 = vpop.f32.mrf.mxu1 }
 0x129   : > { %846 = vst [vmem:[%s1393_s21 + $0x70] sm:$0xff] %v814_v42  ;;  %862 = vst [vmem:[%s1393_s21 + $0xf0] sm:$0xff] %v830_v43  ;;  %v815_v48 = vadd.f32 %v1389_v47, %v646_v44  ;;  %v831_v49 = vadd.f32 %v1389_v47, %v686_v45 }
 0x12b   : > { %847 = vst [vmem:[%s1393_s21 + $0x78] sm:$0xff] %v815_v48  ;;  %863 = vst [vmem:[%s1393_s21 + $0xf8] sm:$0xff] %v831_v49 }
 0x12c   : > { %1156 = shalt.err (!%p1153_p8)
}
 0x12d   : > { %s1157_s8 = scalar_lea.hbm %s1456_s28, 4096  ;;  %s1161_s11 = scalar_lea.hbm %s1515_s3, 8192 }
 0x12e   : > { %p1158_p11 = scmp.ne.s32.totalorder %s1456_s28, %s1157_s8  ;;  %p1162_p0 = scmp.lt.s32.totalorder %s1456_s28, %s1515_s3 }
 0x12f   : > { %p1163_p1 = scmp.lt.s32.totalorder %s1161_s11, %s1157_s8 }
 0x130   : > { %p1159_p12 = pnand %p1158_p11, %p1285_p5 }
 0x131   : > { %p1164_p2 = por %p1163_p1, %p1162_p0 }
 0x132   : > { %p1160_p13 = pneg %p1159_p12 }
 0x134   : > { %p1165_p3 = pnand %p1164_p2, %p1160_p13 }
 0x136   : > { %1168 = shalt.err (!%p1165_p3)
}
 0x137   : > { %s1223_s21 = smov 256   ;;  %s1224_s23 = smov 512  }
 0x138   : > { %s1225_s15 = smov 16  }
 0x139   : > { %1052 = dma.vmem_to_hbm [thread:$0]  (%p1285_p5), %s1458_s26, 4096, %s1456_s28, %s865_s29, %s1223_s21, %s1224_s23, %s1225_s15  }
 0x13a PF: > { %s896_s27 = sand.u32 1, %s1199_s12   ;;  %p1055_p4 = pnand %p997_p10, %p1296_p9 }
 0x13b   : > { %s897_s30 = scalar_lea.sflag [#allocation5], %s896_s27 }
 0x13c   : > { %p1056_p6 = pneg %p1055_p4 }
 0x13e   : > { %1194 = dma.done.wait (%p1056_p6), %s897_s30, 4096  }
 0x13f   : > { %1196 = vsyncadd (%p1056_p6), %s897_s30, 4294963200  ;;  %s16_s17 = sadd.s32 1, %s1219_s17   ;;  %s1518_s12 = smov %s1203_s13 }
 0x140   : > { %p13_p7 = scmp.ge.s32.totalorder %s16_s17, 4   ;;  %s1519_s13 = smov %s1207_s14 }
 0x141   : > { %s1520_s14 = smov %s1294_s24  ;;  %s1521_s15 = smov %s1215_s16 }
 0x142   : > { %s1522_s16 = smov %s1524_s20  ;;  %15 = sbr.rel (!%p13_p7) target bundleno = 4 (0x4), region = 124 }
 0x147   :  { %902 = vsyncpa [#allocation5], 1 }
 0x148   :  { %904 = vsyncpa [#allocation5 + $0x1], 1 }

</bundles_post_ra>
